<compile_context>
chip_gen: v5e
topology: v5e:2x2
jax: 0.10.0
libtpu: 0.0.40
codegen_flags: <defaults>
</compile_context>

<pallas_src>
import jax
import jax.numpy as jnp
from jax.experimental import pallas as pl
from jax.experimental.pallas import tpu as pltpu

_LANE = 128          # lane width (last-dim vreg tile)
_SUBLANE = 8         # f32 sublane tile (channels pad to this in VMEM)
_MAX_BATCH_BLOCK = 128   # bound on batch rows folded into one block
_VMEM_BYTES = None       # cached per-core VMEM capacity


def _round_up(x, m):
    return ((x + m - 1) // m) * m


def _cdiv(a, b):
    return -(-a // b)


def _vmem_capacity_bytes():
    """Per-core VMEM capacity; falls back to the smallest known part (v7x)."""
    global _VMEM_BYTES
    if _VMEM_BYTES is None:
        try:
            cap = int(pltpu.get_tpu_info().vmem_capacity_bytes)
            _VMEM_BYTES = cap if cap > 0 else (64 << 20)
        except Exception:
            _VMEM_BYTES = 64 << 20
    return _VMEM_BYTES


def _choose_tiling(n, c_in, c_out, dhw, vmem_bytes):
    """Pick (nb, tile, num_batch_blocks, num_voxel_tiles, stream_budget)."""
    # Double-buffered f32 x + out streams; channel dims pad to 8 sublanes.
    bytes_per_voxel = 2 * (_round_up(c_in, _SUBLANE) +
                           _round_up(c_out, _SUBLANE)) * 4
    stream_budget = min((vmem_bytes * 3) // 8, 48 << 20)   # 24 MiB v7x, 48 MiB v5e/v6e
    stream_budget = max(stream_budget, 4 << 20)
    max_block_voxels = max(stream_budget // bytes_per_voxel, _LANE)

    if dhw > max_block_voxels:
        # Voxel axis alone fills the VMEM budget: big lane-dense tiles, nb=1.
        tile = (max_block_voxels // _LANE) * _LANE
        return 1, tile, n, _cdiv(dhw, tile), stream_budget

    # Whole spatial extent fits in one block; fold batch rows in to amortize
    # the fixed per-grid-step overhead ...
    nb = min(n, max(max_block_voxels // max(dhw, 1), 1), _MAX_BATCH_BLOCK)
    # ... but keep >= 2 grid steps whenever possible (v7x has 2 TensorCores).
    while nb > 1 and _cdiv(n, nb) < 2:
        nb = max(nb // 2, 1)

    tile, num_tiles = dhw, 1
    if n == 1 and dhw >= 2 * _LANE:
        # A single full-extent block would leave one v7x TensorCore idle:
        # split the voxel axis into (at least) two lane-dense tiles.
        tile = min(_round_up(_cdiv(dhw, 2), _LANE), dhw)
        if tile < dhw:
            num_tiles = _cdiv(dhw, tile)
        else:
            tile = dhw

    return nb, tile, _cdiv(n, nb), num_tiles, stream_budget


def _outconv_kernel(x_ref, w_ref, b_ref, o_ref):
    # x_ref: (NB, C_in, TV)   w_ref: (C_out, C_in)   b_ref: (C_out, 1)
    # o_ref: (NB, C_out, TV)
    nb = x_ref.shape[0]
    w = w_ref[...]
    b = b_ref[...]
    if nb == 1:
        acc = jnp.dot(w, x_ref[0], preferred_element_type=jnp.float32)
        o_ref[0] = (acc + b).astype(o_ref.dtype)
    else:
        # Batch-blocked path: batched matmul over the nb folded batch rows.
        wb = jnp.broadcast_to(w, (nb,) + w.shape)
        acc = jnp.einsum("boc,bcv->bov", wb, x_ref[...],
                         preferred_element_type=jnp.float32)
        o_ref[...] = (acc + b[None]).astype(o_ref.dtype)


@jax.jit
def out_conv(x, weight, bias):
    """1x1x1 Conv3d forward (PyTorch OutConv).

    x:      (N, C_in, D, H, W)  float32  (NCDHW, as in PyTorch)
    weight: (C_out, C_in, 1, 1, 1)
    bias:   (C_out,)
    returns (N, C_out, D, H, W)
    """
    n, c_in, d, h, w = x.shape
    c_out = weight.shape[0]
    dhw = d * h * w

    vmem_bytes = _vmem_capacity_bytes()
    nb, tile, n_bblk, n_vblk, stream_budget = _choose_tiling(
        n, c_in, c_out, dhw, vmem_bytes)
    # Raise the scoped-VMEM limit to cover the (generation-aware) stream
    # budget plus headroom for the f32 accumulator / weights, while staying
    # well inside physical VMEM on every generation.
    vmem_limit = int(min(max(vmem_bytes - (8 << 20), stream_budget),
                         2 * stream_budget))

    # Channel-major views -- pure reshapes only, no HBM transpose.
    x3 = x.reshape(n, c_in, dhw)                   # (N, C_in, DHW)
    w_mat = weight.reshape(c_out, c_in)            # (C_out, C_in)
    b_mat = bias.reshape(c_out, 1)                 # (C_out, 1)

    cost = pl.CostEstimate(
        flops=2 * n * c_out * c_in * dhw,
        transcendentals=0,
        bytes_accessed=4 * (n * (c_in + c_out) * dhw + c_out * c_in + c_out),
    )

    out3 = pl.pallas_call(
        _outconv_kernel,
        out_shape=jax.ShapeDtypeStruct((n, c_out, dhw), x.dtype),
        grid_spec=pltpu.PrefetchScalarGridSpec(
            num_scalar_prefetch=0,
            grid=(n_bblk, n_vblk),
            in_specs=[
                pl.BlockSpec((nb, c_in, tile), lambda bb, vb: (bb, 0, vb)),
                pl.BlockSpec((c_out, c_in), lambda bb, vb: (0, 0)),
                pl.BlockSpec((c_out, 1), lambda bb, vb: (0, 0)),
            ],
            out_specs=pl.BlockSpec((nb, c_out, tile),
                                   lambda bb, vb: (bb, 0, vb)),
        ),
        compiler_params=pltpu.CompilerParams(
            dimension_semantics=("parallel", "parallel"),
            vmem_limit_bytes=vmem_limit,
        ),
        cost_estimate=cost,
    )(x3, w_mat, b_mat)

    # Pure reshape back to NCDHW -- no transpose.
    return out3.reshape(n, c_out, d, h, w)


def _reference(x, weight, bias):
    # Pure-JAX reference: 1x1x1 conv == einsum over channels.
    w2 = weight.reshape(weight.shape[0], weight.shape[1])   # (C_out, C_in)
    return jnp.einsum("ncdhw,oc->nodhw", x, w2) + bias.reshape(1, -1, 1, 1, 1)


if __name__ == "__main__":
    key = jax.random.PRNGKey(0)

    def make_params(k, c_in, c_out):
        kw, kb = jax.random.split(k)
        bound = 1.0 / (c_in ** 0.5)       # matches nn.Conv3d default init range
        weight = jax.random.uniform(kw, (c_out, c_in, 1, 1, 1),
                                    minval=-bound, maxval=bound,
                                    dtype=jnp.float32)
        bias = jax.random.uniform(kb, (c_out,), minval=-bound, maxval=bound,
                                  dtype=jnp.float32)
        return weight, bias

    configs = [
        # (N, C_in, C_out, D, H, W)
        (2, 4, 3, 4, 8, 8),   # primary case: grid (2, 1), nb=1, MXU dot path
        (1, 4, 3, 4, 8, 8),   # single batch row: voxel axis split into 2 tiles
        (5, 4, 3, 2, 4, 8),   # tiny DHW, batch-blocked (nb>1), ragged last block
    ]
    for i, (N, C_IN, C_OUT, D, H, W) in enumerate(configs):
        kx, kp, key = jax.random.split(key, 3)
        x = jax.random.normal(kx, (N, C_IN, D, H, W), dtype=jnp.float32)
        weight, bias = make_params(kp, C_IN, C_OUT)

        out = out_conv(x, weight, bias)
        jax.block_until_ready(out)

        ref = _reference(x, weight, bias)
        assert out.shape == (N, C_OUT, D, H, W), f"bad shape in config {i}"
        assert jnp.allclose(out, ref, atol=1e-5, rtol=1e-5), f"mismatch in config {i}"

    print("KERNEL_OK")
</pallas_src>

<mosaic_0001>
module attributes {stable_mosaic.version = 11 : i64} {
  func.func @_outconv_kernel(%arg0: i32, %arg1: i32, %arg2: memref<1x4x256xf32, #tpu.memory_space<vmem>>, %arg3: memref<3x4xf32, #tpu.memory_space<vmem>>, %arg4: memref<3x1xf32, #tpu.memory_space<vmem>>, %arg5: memref<1x3x256xf32, #tpu.memory_space<vmem>>) attributes {dimension_semantics = [#tpu.dimension_semantics<parallel>, #tpu.dimension_semantics<parallel>], iteration_bounds = array<i64: 2, 1>, scalar_prefetch = 0 : i64, scratch_operands = 0 : i64, tpu.core_type = #tpu.core_type<tc>, window_params = [{transform_indices = @transform_0, window_bounds = array<i64: 1, 4, 256>}, {pipeline_mode = #tpu.pipeline_mode<synchronous>, transform_indices = @transform_1, window_bounds = array<i64: 3, 4>}, {pipeline_mode = #tpu.pipeline_mode<synchronous>, transform_indices = @transform_2, window_bounds = array<i64: 3, 1>}, {transform_indices = @transform_3, window_bounds = array<i64: 1, 3, 256>}]} {
    %c0 = arith.constant 0 : index
    %c0_0 = arith.constant 0 : index
    %0 = vector.load %arg3[%c0, %c0_0] : memref<3x4xf32, #tpu.memory_space<vmem>>, vector<3x4xf32>
    %c0_1 = arith.constant 0 : index
    %c0_2 = arith.constant 0 : index
    %1 = vector.load %arg4[%c0_1, %c0_2] : memref<3x1xf32, #tpu.memory_space<vmem>>, vector<3x1xf32>
    %c0_3 = arith.constant 0 : index
    %c0_4 = arith.constant 0 : index
    %c0_5 = arith.constant 0 : index
    %2 = vector.load %arg2[%c0_3, %c0_4, %c0_5] : memref<1x4x256xf32, #tpu.memory_space<vmem>>, vector<1x4x256xf32>
    %3 = vector.shape_cast %2 : vector<1x4x256xf32> to vector<4x256xf32>
    %cst = arith.constant dense<0.000000e+00> : vector<3x256xf32>
    %4 = tpu.matmul %0, %3, %cst {dimension_numbers = #tpu.dot_dimension_numbers<[1], [0], [0], [1], [0, 0, 1, 1], [], []>} : vector<3x4xf32>, vector<4x256xf32>, vector<3x256xf32> -> vector<3x256xf32>
    %5 = vector.broadcast %1 : vector<3x1xf32> to vector<3x256xf32>
    %6 = arith.addf %4, %5 : vector<3x256xf32>
    %c0_6 = arith.constant 0 : index
    %c0_7 = arith.constant 0 : index
    %c0_8 = arith.constant 0 : index
    %7 = vector.load %arg5[%c0_6, %c0_7, %c0_8] : memref<1x3x256xf32, #tpu.memory_space<vmem>>, vector<1x3x256xf32>
    %8 = vector.shape_cast %7 : vector<1x3x256xf32> to vector<3x256xf32>
    %9 = vector.shape_cast %6 : vector<3x256xf32> to vector<1x3x256xf32>
    tpu.vector_store %arg5[%c0_6, %c0_7, %c0_8], %9 {strides = array<i32>} : memref<1x3x256xf32, #tpu.memory_space<vmem>>, vector<1x3x256xf32>,
    return
  }
  func.func @transform_0(%arg0: i32, %arg1: i32) -> (i32, i32, i32) {
    %c0_i32 = arith.constant 0 : i32
    %c0_i32_0 = arith.constant 0 : i32
    return %arg0, %c0_i32, %arg1 : i32, i32, i32
  }
  func.func @transform_1(%arg0: i32, %arg1: i32) -> (i32, i32) {
    %c0_i32 = arith.constant 0 : i32
    %c0_i32_0 = arith.constant 0 : i32
    %c0_i32_1 = arith.constant 0 : i32
    return %c0_i32, %c0_i32_0 : i32, i32
  }
  func.func @transform_2(%arg0: i32, %arg1: i32) -> (i32, i32) {
    %c0_i32 = arith.constant 0 : i32
    %c0_i32_0 = arith.constant 0 : i32
    %c0_i32_1 = arith.constant 0 : i32
    return %c0_i32, %c0_i32_0 : i32, i32
  }
  func.func @transform_3(%arg0: i32, %arg1: i32) -> (i32, i32, i32) {
    %c0_i32 = arith.constant 0 : i32
    %c0_i32_0 = arith.constant 0 : i32
    return %arg0, %c0_i32, %arg1 : i32, i32, i32
  }
}

</mosaic_0001>

<bundles_post_ra>
// kernel: out_conv.1
= control target key start
LH: loop header
LB: loop body
LE: loop exit
PB: predicated region body
PF: predicated region fallthrough
CT: control target
= control target key end

     0   :  { %s452_s12 = smov 0   ;;  %s454_s13 = smov 0   ;;  %s494_s0 = inlined_call_operand.vmem [shape: f32[2,4,256], index: 0, kind: input, shape index: {}]   ;;  %s495_s1 = inlined_call_operand.vmem [shape: f32[3,4], index: 1, kind: input, shape index: {}]   ;;  %s496_s2 = inlined_call_operand.vmem [shape: f32[3,1], index: 2, kind: input, shape index: {}]   ;;  %s497_s3 = inlined_call_operand.vmem [shape: f32[2,3,256], index: 3, kind: output, shape index: {}]  }
   0x1   :  { %s456_s14 = smov 0  }
   0x2 LB: > { %s25_s15 = sadd.s32 1, %s425_s13  ;;  %p368_p0 = scmp.ge.s32.totalorder %s429_s14, 1  ;;  %s429_s14 = sphi %s456_s14, %s13_s14   ;;  %s425_s13 = sphi %s454_s13, %s499_s13   ;;  %s421_s12 = sphi %s452_s12, %s498_s12  }
   0x3   : > { %p27_p1 = scmp.ge.s32.totalorder %s25_s15, 2  ;;  %p158_p2 = scmp.lt.s32.totalorder %s429_s14, 3 }
   0x5   : > { %s501_s15 = smov (%p27_p1, %s25_s15), 0  ;;  %p159_p3 = pnand %p368_p0, %p158_p2 }
   0x6   : > { %p191_p4 = scmp.lt.s32.totalorder (!%p159_p3), %s421_s12, 1 }
   0x7   : > { %162 = sbr.rel (%p159_p3) target bundleno = 157 (0x9d), region = 32 }
   0xc   : > { %v431_v0 = vmov 0   ;;  %v211_v1 = vld [vmem:[%s496_s2] sm:$0x7]  ;;  %s503_s12 = smov (!%p191_p4, %s421_s12), 1  ;;  %vm226_vm0 = vcmask 1043456   ;;  %vm222_vm1 = vcmask 31744  }
   0xd   : > { %406 = vset.pattern.permute.xlu0 %v431_v0  ;;  %s379_s18 = sshll.u32 %s503_s12, 3  ;;  %v210_v3 = vld [vmem:[%s495_s1] sm:$0x7] }
   0xe   : > { %215 = vperm.xlu0 %406, %v211_v1   ;;  %s198_s21 = scalar_lea.vmem %s494_s0, %s379_s18  ;;  %s208_s26 = scalar_lea.vmem %s497_s3, %s379_s18 }
   0xf   : > { %v212_v2 = vld [vmem:[%s198_s21] sm:$0xff] }
  0x10   : > { %219 = vst [vmem:[#allocation1] ss:$2 sm:$0xff] %v212_v2 }
  0x17   : > { %v220_v4 = vld.sshfl [vmem:[#allocation1] sm:$0xff pattern:$0x75316420]  ;;  %v221_v5 = vld.sshfl [vmem:[#allocation1 + $0x8] sm:$0xff pattern:$0x75316420] }
  0x18   : > { %373 = vmatpush.msk.msra.mxu0 %vm226_vm0, %v220_v4  ;;  %375 = vmatpush.msk.msra.mxu1 %vm226_vm0, %v221_v5 }
  0x19   : > { %374 = vmatmul.msk.f32.vlgmr.msra.gmra.mxu0 %vm222_vm1, %v210_v3  ;;  %376 = vmatmul.msk.f32.vlgmr.msra.gmra.mxu1 %vm222_vm1, %v210_v3 }
  0x80   : > { %v216_v6 = vpop.permute.xlu0 %215 }
  0x96   : > { %v248_v7 = vpop.f32.mrf.mxu0  ;;  %v268_v8 = vpop.f32.mrf.mxu1 }
  0x97   : > { %v269_v9 = vadd.f32 %v268_v8, %v216_v6  ;;  %v249_v10 = vadd.f32 %v248_v7, %v216_v6 }
  0x99   : > { %v273_v11 = vrot.slane %v269_v9, 4 }
  0x9b   : > { %v274_v12 = vsel %vm226_vm0, %v249_v10, %v273_v11 }
  0x9c   : > { %276 = vst [vmem:[%s208_s26] sm:$0x77] %v274_v12 }
  0x9d PF: > { %s13_s14 = sadd.s32 1, %s429_s14   ;;  %s498_s12 = smov %s425_s13 }
  0x9e   : > { %p10_p5 = scmp.ge.s32.totalorder %s13_s14, 4   ;;  %s499_s13 = smov %s501_s15 }
  0xa0   :  { %12 = sbr.rel (!%p10_p5) target bundleno = 2 (0x2), region = 62 }

</bundles_post_ra>
